<compile_context>
chip_gen: v6e
topology: v6e:2x2x1
jax: 0.10.0
libtpu: 0.0.40
codegen_flags: <defaults>
</compile_context>

<pallas_src>
import functools

import jax
import jax.numpy as jnp
from jax import lax
from jax.experimental import pallas as pl
from jax.experimental.pallas import tpu as pltpu


def _round_up(x, m):
    return (x + m - 1) // m * m


def _tpu_config():
    """Generation-aware tiling / VMEM budget; conservative defaults for unknown chips."""
    kind = ""
    try:
        kind = jax.devices()[0].device_kind.lower()
    except Exception:
        pass
    is_v7 = ("v7" in kind) or ("7x" in kind)
    is_v5e_v6 = any(t in kind for t in ("v5e", "v5 lite", "v5lite", "v6"))
    if is_v7:          # 64 MiB physical VMEM, 3.2 TB/s HBM, 2 TensorCores
        return dict(num_cores=2, vmem_limit=40 << 20, block_bytes=4 << 20,
                    max_tile_n=1024, max_tile_f=2048)
    if is_v5e_v6:      # 128 MiB physical VMEM, 1 TensorCore
        return dict(num_cores=1, vmem_limit=64 << 20, block_bytes=6 << 20,
                    max_tile_n=1024, max_tile_f=2048)
    return dict(num_cores=1, vmem_limit=32 << 20, block_bytes=2 << 20,
                max_tile_n=512, max_tile_f=2048)


def _choose_tile_f(f, cfg):
    """Lane-dense F tile (multiple of 128). Keep >= num_cores F tiles on multi-TC
    chips (when F is wide enough) so both v7x TensorCores are used; pick the tile so
    that padding F up to a multiple of it wastes little HBM traffic."""
    f_pad0 = _round_up(f, 128)
    nf = pl.cdiv(f_pad0, cfg["max_tile_f"])          # min tiles respecting max_tile_f
    if f_pad0 >= 128 * cfg["num_cores"]:
        nf = max(nf, cfg["num_cores"])               # keep all TensorCores busy
    return _round_up(pl.cdiv(f_pad0, nf), 128)


def _x_block_spec(block_shape, index_map, n_buffers):
    """Feature-block spec; requests deeper pipelining when asked (safe fallback)."""
    if n_buffers > 2:
        try:
            return pl.BlockSpec(block_shape, index_map,
                                pipeline_mode=pl.Buffered(n_buffers))
        except (TypeError, AttributeError):
            pass
    return pl.BlockSpec(block_shape, index_map)


# ----------------------------------------------------------------------------
# Kernel 1: plain mean over dim 0 (batch_index is None)
# ----------------------------------------------------------------------------
def _mean_kernel(x_ref, o_ref, acc_ref, *, total_n):
    k = pl.program_id(1)                      # reduction axis (innermost)

    @pl.when(k == 0)
    def _():
        acc_ref[...] = jnp.zeros_like(acc_ref)

    x = x_ref[...].astype(jnp.float32)        # (tile_n, tile_f)
    tile_n, tile_f = x.shape
    # Fold tile_n rows into 8 sublane rows: pure VPU adds, no XLU in the hot loop.
    acc_ref[...] += x.reshape(tile_n // 8, 8, tile_f).sum(axis=0)

    @pl.when(k == pl.num_programs(1) - 1)
    def _():
        total = jnp.sum(acc_ref[...], axis=0, keepdims=True)   # single 8->1 reduce
        o_ref[...] = (total * (1.0 / total_n)).astype(o_ref.dtype)


def _mean_tiles(n, f, itemsize, cfg):
    row_align = max(8, 32 // itemsize)        # 8 for f32, 16 for bf16, 32 for int8/fp8
    tile_f = _choose_tile_f(f, cfg)
    f_pad = _round_up(f, tile_f)
    budget_rows = max(row_align, cfg["block_bytes"] // (tile_f * itemsize))
    tile_n = min(cfg["max_tile_n"], budget_rows, _round_up(n, row_align))
    tile_n = max(row_align, (tile_n // row_align) * row_align)

    headroom = int(cfg["vmem_limit"] * 0.85)

    def vmem_bytes(tn, x_bufs):
        return (x_bufs * tn * tile_f * itemsize       # feature blocks
                + 8 * tile_f * 4                      # f32 accumulator scratch
                + 2 * tile_f * itemsize)              # (1, tile_f) output blocks

    while tile_n > row_align and vmem_bytes(tile_n, 2) > headroom:
        tile_n -= row_align
    n_pad = _round_up(n, tile_n)
    n_steps = n_pad // tile_n
    x_bufs = 3 if (n_steps >= 3 and vmem_bytes(tile_n, 3) <= headroom) else 2
    return tile_n, n_pad, tile_f, f_pad, x_bufs


def mean_on_graph(node_features, *, keepdim=False):
    """mean(node_features, dim=0, keepdim=keepdim) via a tiled Pallas reduction."""
    cfg = _tpu_config()
    n, f = node_features.shape
    out_dtype = node_features.dtype
    if not jnp.issubdtype(out_dtype, jnp.floating):
        # TODO(synk): integer inputs computed in f32 (torch.mean rejects ints anyway).
        node_features = node_features.astype(jnp.float32)
        out_dtype = jnp.float32

    itemsize = jnp.dtype(node_features.dtype).itemsize
    tile_n, n_pad, tile_f, f_pad, x_bufs = _mean_tiles(n, f, itemsize, cfg)

    x = node_features
    if (n_pad, f_pad) != (n, f):
        # zero padding does not change the sum; we divide by the true N below
        x = jnp.pad(x, ((0, n_pad - n), (0, f_pad - f)))

    grid = (f_pad // tile_f, n_pad // tile_n)   # (parallel F tiles, reduction N tiles)
    out = pl.pallas_call(
        functools.partial(_mean_kernel, total_n=n),
        out_shape=jax.ShapeDtypeStruct((1, f_pad), out_dtype),
        grid_spec=pltpu.PrefetchScalarGridSpec(
            num_scalar_prefetch=0,
            grid=grid,
            in_specs=[_x_block_spec((tile_n, tile_f), lambda fi, k: (k, fi), x_bufs)],
            out_specs=pl.BlockSpec((1, tile_f), lambda fi, k: (0, fi)),
            scratch_shapes=[pltpu.VMEM((8, tile_f), jnp.float32)],
        ),
        compiler_params=pltpu.CompilerParams(
            dimension_semantics=("parallel", "arbitrary"),
            vmem_limit_bytes=cfg["vmem_limit"]),
    )(x)
    out = out[:, :f]
    return out if keepdim else out[0]


# ----------------------------------------------------------------------------
# Kernel 2: scatter-mean over dim 0 (segment mean; one-hot matmul on the MXU)
# ----------------------------------------------------------------------------
def _segment_mean_kernel(idx_ref, x_ref, inv_ref, o_ref, sum_ref):
    k = pl.program_id(1)                      # reduction axis (innermost)

    @pl.when(k == 0)
    def _():
        sum_ref[...] = jnp.zeros_like(sum_ref)

    x = x_ref[...]                            # (tile_n, tile_f), compute dtype
    idx = idx_ref[...]                        # (1, tile_n) int32, lane-major
    g_pad = sum_ref.shape[0]
    # One-hot built directly as (g_pad, tile_n) from the lane-major index row:
    # transpose-free, MXU contraction depth = tile_n (>= 128).
    # TODO(synk): if ever VALU-bound at very large g_pad, hoist this loop-invariant
    # iota/compare into a scratch built once.
    seg_ids = lax.broadcasted_iota(jnp.int32, (g_pad, idx.shape[1]), 0)
    mask = (idx == seg_ids).astype(x.dtype)
    # (g_pad, tile_n) @ (tile_n, tile_f) -> (g_pad, tile_f), f32 accumulation.
    sum_ref[...] += jnp.dot(mask, x, preferred_element_type=jnp.float32)

    @pl.when(k == pl.num_programs(1) - 1)
    def _():
        # inv_ref holds precomputed 1/count (0 for empty segments) -> just a multiply.
        o_ref[...] = (sum_ref[...] * inv_ref[...]).astype(o_ref.dtype)


def _segment_tiles(n, f, itemsize, g_pad, out_itemsize, cfg):
    tile_f = _choose_tile_f(f, cfg)
    headroom = int(cfg["vmem_limit"] * 0.85)

    def pick_tile_n(tf):
        # tile_n is both the MXU contraction depth and the lane extent of the index
        # block -> multiple of 128.
        budget_rows = max(128, cfg["block_bytes"] // (tf * itemsize))
        tn = min(cfg["max_tile_n"], budget_rows, _round_up(n, 128))
        return max(128, (tn // 128) * 128)

    def vmem_bytes(tn, tf, x_bufs):
        return (x_bufs * tn * tf * itemsize          # feature blocks
                + 2 * 8 * tn * 4                     # (1, tile_n) int32 index blocks
                + 2 * g_pad * tf * out_itemsize      # (g_pad, tile_f) output blocks
                + g_pad * tf * 4                     # f32 per-segment sum scratch
                + 2 * g_pad * 128 * 4)               # (g_pad, 1) inv-count blocks

    tile_n = pick_tile_n(tile_f)
    # Shrink tile_f first: keeps MXU contraction depth and eases the accumulator
    # read-modify-write store pressure (single vst slot on v5e) for large g_pad.
    while tile_f > 128 and vmem_bytes(tile_n, tile_f, 2) > headroom:
        tile_f -= 128
        tile_n = pick_tile_n(tile_f)
    while tile_n > 128 and vmem_bytes(tile_n, tile_f, 2) > headroom:
        tile_n -= 128

    f_pad = _round_up(f, tile_f)
    n_pad = _round_up(n, tile_n)
    n_steps = n_pad // tile_n
    x_bufs = 3 if (n_steps >= 3 and vmem_bytes(tile_n, tile_f, 3) <= headroom) else 2
    return tile_n, n_pad, tile_f, f_pad, x_bufs


def scatter_mean_on_graph(node_features, batch_index, num_segments, *,
                          use_bf16_matmul=False):
    """scatter(src=node_features, dim=0, index=batch_index, reduce='mean').

    Note: batch_index values outside [0, num_segments) contribute to no segment
    (segment_sum-style drop semantics) instead of raising like torch.scatter.
    """
    cfg = _tpu_config()
    n, f = node_features.shape
    out_dtype = node_features.dtype
    x = node_features
    if not jnp.issubdtype(out_dtype, jnp.floating):
        # TODO(synk): integer features computed in f32 (v7x MXU has no int datapath;
        # torch integer-mean truncation semantics are not reproduced).
        x = x.astype(jnp.float32)
        out_dtype = jnp.float32
    if use_bf16_matmul and x.dtype == jnp.float32:
        # Opt-in: bf16 one-hot x bf16 features (f32 accumulation) ~3x MXU rate and
        # half the HBM traffic; precision loss limited to rounding inputs to bf16.
        x = x.astype(jnp.bfloat16)

    itemsize = jnp.dtype(x.dtype).itemsize
    out_itemsize = jnp.dtype(out_dtype).itemsize
    g_pad = _round_up(max(int(num_segments), 1), 8)
    tile_n, n_pad, tile_f, f_pad, x_bufs = _segment_tiles(
        n, f, itemsize, g_pad, out_itemsize, cfg)

    if (n_pad, f_pad) != (n, f):
        x = jnp.pad(x, ((0, n_pad - n), (0, f_pad - f)))
    idx = batch_index.astype(jnp.int32)

    # Per-segment reciprocal counts precomputed with a tiny segment_sum: removes the
    # per-step XLU count reduction from the kernel and turns finalize into a multiply.
    cnt = jax.ops.segment_sum(jnp.ones((n,), jnp.float32), idx,
                              num_segments=num_segments)
    inv = jnp.where(cnt > 0.0, 1.0 / jnp.maximum(cnt, 1.0), 0.0)
    inv = jnp.pad(inv, (0, g_pad - num_segments)).reshape(g_pad, 1)

    if n_pad != n:
        # padded rows point at segment g_pad -> they match no real/padded segment
        idx = jnp.pad(idx, (0, n_pad - n), constant_values=g_pad)
    idx2d = idx.reshape(1, n_pad)             # lane-major index row

    grid = (f_pad // tile_f, n_pad // tile_n)
    out = pl.pallas_call(
        _segment_mean_kernel,
        out_shape=jax.ShapeDtypeStruct((g_pad, f_pad), out_dtype),
        grid_spec=pltpu.PrefetchScalarGridSpec(
            num_scalar_prefetch=0,
            grid=grid,
            in_specs=[
                pl.BlockSpec((1, tile_n), lambda fi, k: (0, k)),              # index
                _x_block_spec((tile_n, tile_f), lambda fi, k: (k, fi), x_bufs),  # x
                pl.BlockSpec((g_pad, 1), lambda fi, k: (0, 0)),               # 1/count
            ],
            out_specs=pl.BlockSpec((g_pad, tile_f), lambda fi, k: (0, fi)),
            scratch_shapes=[pltpu.VMEM((g_pad, tile_f), jnp.float32)],
        ),
        compiler_params=pltpu.CompilerParams(
            dimension_semantics=("parallel", "arbitrary"),
            vmem_limit_bytes=cfg["vmem_limit"]),
    )(idx2d, x, inv)
    return out[:num_segments, :f]


# ----------------------------------------------------------------------------
if __name__ == "__main__":
    key = jax.random.PRNGKey(0)
    N, F, G = 16, 32, 4  # nodes, features, graphs

    node_features = jax.random.normal(key, (N, F), dtype=jnp.float32)
    # 4 graphs with 3, 2, 4, 7 nodes respectively
    batch_index = jnp.array(
        [0, 0, 0, 1, 1, 2, 2, 2, 2, 3, 3, 3, 3, 3, 3, 3], dtype=jnp.int32)

    # Path 1: batch_index is None -> plain mean over dim 0
    out_mean = jax.block_until_ready(mean_on_graph(node_features, keepdim=False))
    ref_mean = jnp.mean(node_features, axis=0)
    assert out_mean.shape == (F,)
    assert jnp.allclose(out_mean, ref_mean, atol=1e-5, rtol=1e-5)

    out_mean_kd = jax.block_until_ready(mean_on_graph(node_features, keepdim=True))
    assert out_mean_kd.shape == (1, F)
    assert jnp.allclose(out_mean_kd[0], ref_mean, atol=1e-5, rtol=1e-5)

    # Path 2: batch_index given -> scatter(reduce='mean') (segment mean)
    out_seg = jax.block_until_ready(
        scatter_mean_on_graph(node_features, batch_index, G))
    seg_sum = jax.ops.segment_sum(node_features, batch_index, num_segments=G)
    seg_cnt = jax.ops.segment_sum(
        jnp.ones((N, 1), jnp.float32), batch_index, num_segments=G)
    ref_seg = seg_sum / jnp.maximum(seg_cnt, 1.0)
    assert out_seg.shape == (G, F)
    assert jnp.allclose(out_seg, ref_seg, atol=1e-5, rtol=1e-5)

    print("KERNEL_OK")
</pallas_src>

<mosaic_0001>
module attributes {stable_mosaic.version = 11 : i64} {
  func.func @_mean_kernel(%arg0: i32, %arg1: i32, %arg2: memref<16x128xf32, #tpu.memory_space<vmem>>, %arg3: memref<1x128xf32, #tpu.memory_space<vmem>>, %arg4: memref<8x128xf32, #tpu.memory_space<vmem>>) attributes {dimension_semantics = [#tpu.dimension_semantics<parallel>, #tpu.dimension_semantics<arbitrary>], iteration_bounds = array<i64: 1, 1>, scalar_prefetch = 0 : i64, scratch_operands = 1 : i64, tpu.core_type = #tpu.core_type<tc>, window_params = [{transform_indices = @transform_0, window_bounds = array<i64: 16, 128>}, {transform_indices = @transform_1, window_bounds = array<i64: 1, 128>}]} {
    %c0_i32 = arith.constant 0 : i32
    %0 = arith.cmpi eq, %arg1, %c0_i32 : i32
    %1 = arith.extui %0 : i1 to i32
    %c0_i32_0 = arith.constant 0 : i32
    %2 = arith.cmpi ne, %1, %c0_i32_0 : i32
    scf.if %2 {
      %cst_8 = arith.constant 0.000000e+00 : f32
      %12 = vector.broadcast %cst_8 : f32 to vector<8x128xf32>
      %c0_9 = arith.constant 0 : index
      %c0_10 = arith.constant 0 : index
      %13 = vector.load %arg4[%c0_9, %c0_10] : memref<8x128xf32, #tpu.memory_space<vmem>>, vector<8x128xf32>
      tpu.vector_store %arg4[%c0_9, %c0_10], %12 {strides = array<i32>} : memref<8x128xf32, #tpu.memory_space<vmem>>, vector<8x128xf32>,
    } else {
    }
    %c0 = arith.constant 0 : index
    %c0_1 = arith.constant 0 : index
    %3 = vector.load %arg2[%c0, %c0_1] : memref<16x128xf32, #tpu.memory_space<vmem>>, vector<16x128xf32>
    %c0_2 = arith.constant 0 : index
    %c0_3 = arith.constant 0 : index
    %4 = vector.load %arg4[%c0_2, %c0_3] : memref<8x128xf32, #tpu.memory_space<vmem>>, vector<8x128xf32>
    %5 = vector.shape_cast %3 : vector<16x128xf32> to vector<2x8x128xf32>
    %cst = arith.constant dense<0.000000e+00> : vector<8x128xf32>
    %6 = vector.multi_reduction <add>, %5, %cst [0] : vector<2x8x128xf32> to vector<8x128xf32>
    %7 = arith.addf %4, %6 : vector<8x128xf32>
    %c0_4 = arith.constant 0 : index
    %c0_5 = arith.constant 0 : index
    %8 = vector.load %arg4[%c0_4, %c0_5] : memref<8x128xf32, #tpu.memory_space<vmem>>, vector<8x128xf32>
    tpu.vector_store %arg4[%c0_4, %c0_5], %7 {strides = array<i32>} : memref<8x128xf32, #tpu.memory_space<vmem>>, vector<8x128xf32>,
    %c0_i32_6 = arith.constant 0 : i32
    %9 = arith.cmpi eq, %arg1, %c0_i32_6 : i32
    %10 = arith.extui %9 : i1 to i32
    %c0_i32_7 = arith.constant 0 : i32
    %11 = arith.cmpi ne, %10, %c0_i32_7 : i32
    scf.if %11 {
      %c0_8 = arith.constant 0 : index
      %c0_9 = arith.constant 0 : index
      %12 = vector.load %arg4[%c0_8, %c0_9] : memref<8x128xf32, #tpu.memory_space<vmem>>, vector<8x128xf32>
      %cst_10 = arith.constant dense<0.000000e+00> : vector<128xf32>
      %13 = vector.multi_reduction <add>, %12, %cst_10 [0] : vector<8x128xf32> to vector<128xf32>
      %14 = vector.shape_cast %13 : vector<128xf32> to vector<1x128xf32>
      %cst_11 = arith.constant 6.250000e-02 : f32
      %15 = vector.broadcast %cst_11 : f32 to vector<1x128xf32>
      %16 = arith.mulf %14, %15 : vector<1x128xf32>
      %c0_12 = arith.constant 0 : index
      %c0_13 = arith.constant 0 : index
      %17 = vector.load %arg3[%c0_12, %c0_13] : memref<1x128xf32, #tpu.memory_space<vmem>>, vector<1x128xf32>
      tpu.vector_store %arg3[%c0_12, %c0_13], %16 {strides = array<i32>} : memref<1x128xf32, #tpu.memory_space<vmem>>, vector<1x128xf32>,
    } else {
    }
    return
  }
  func.func @transform_0(%arg0: i32, %arg1: i32) -> (i32, i32) {
    %c0_i32 = arith.constant 0 : i32
    return %arg1, %arg0 : i32, i32
  }
  func.func @transform_1(%arg0: i32, %arg1: i32) -> (i32, i32) {
    %c0_i32 = arith.constant 0 : i32
    %c0_i32_0 = arith.constant 0 : i32
    return %c0_i32, %arg0 : i32, i32
  }
}

</mosaic_0001>

<bundles_post_ra>
// kernel: tpu_custom_call.1
= control target key start
LH: loop header
LB: loop body
LE: loop exit
PB: predicated region body
PF: predicated region fallthrough
CT: control target
= control target key end

     0   :  { %6 = vsyncpa [#allocation4], 0  ;;  %s129_s0 = inlined_call_operand.hbm [shape: f32[16,128], index: 0, kind: input, shape index: {}]   ;;  %s130_s1 = inlined_call_operand.hbm [shape: f32[1,128], index: 1, kind: output, shape index: {}]  }
   0x1   :  { %7 = vsyncpa [#allocation5], 0  ;;  %s109_s6 = smov [#allocation3]  }
   0x2   :  { %s13_s7 = sshll.u32 %s109_s6, 4  ;;  %s14_s7 = int_to_ptr.vmem [resolvable:$true] %s13_s7 }
   0x3   :  { %s73_s8 = scalar_lea.vmem %s14_s7, 256  ;;  %p78_p1 = scmp.lt.s32.totalorder %s14_s7, %s14_s7 }
   0x4   :  { %p74_p0 = scmp.ne.s32.totalorder %s14_s7, %s73_s8  ;;  %p79_p2 = scmp.lt.s32.totalorder %s73_s8, %s73_s8 }
   0x6   :  { %p80_p3 = por %p79_p2, %p78_p1 }
   0x8   :  { %p81_p4 = pnand %p80_p3, %p74_p0 }
   0xa   :  { %84 = shalt.err (!%p81_p4)
}
   0xb   :  { %s110_s9 = smov 128   ;;  %s111_s10 = smov 8  }
   0xc   :  { %19 = dma.hbm_to_vmem [thread:$0]  %s129_s0, 256, %s14_s7, [#allocation4], %s110_s9, %s110_s9, %s111_s10  }
   0xd   :  { %105 = dma.done.wait [#allocation4], 256  }
   0xe   :  { %106 = vsyncadd [#allocation4], 4294967040  ;;  %v28_v0 = vld [vmem:[#allocation3] sm:$0xff]  ;;  %v29_v1 = vld [vmem:[#allocation3 + $0x8] sm:$0xff]  ;;  %s112_s13 = smov [#allocation6]  }
   0xf   :  { %v31_v2 = vadd.f32 %v29_v1, %v28_v0  ;;  %s52_s14 = sshll.u32 %s112_s13, 4  ;;  %s53_s14 = int_to_ptr.vmem [resolvable:$true] %s52_s14 }
  0x10   :  { %s85_s15 = scalar_lea.vmem %s53_s14, 16  ;;  %s89_s16 = scalar_lea.vmem %s53_s14, 32 }
  0x11   :  { %v38_v3 = vrot.slane %v31_v2, 4  ;;  %p86_p5 = scmp.ne.s32.totalorder %s53_s14, %s85_s15  ;;  %p90_p6 = scmp.lt.s32.totalorder %s53_s14, %s53_s14 }
  0x12   :  { %p91_p7 = scmp.lt.s32.totalorder %s89_s16, %s85_s15 }
  0x13   :  { %v39_v4 = vadd.f32 %v38_v3, %v31_v2 }
  0x14   :  { %p92_p8 = por %p91_p7, %p90_p6 }
  0x15   :  { %v40_v5 = vrot.slane %v39_v4, 2 }
  0x16   :  { %p93_p9 = pnand %p92_p8, %p86_p5 }
  0x17   :  { %v41_v6 = vadd.f32 %v40_v5, %v39_v4 }
  0x19   :  { %v42_v7 = vrot.slane %v41_v6, 1 }
  0x1b   :  { %v43_v8 = vadd.f32 %v42_v7, %v41_v6 }
  0x1d   :  { %v44_v9 = vmul.f32 0.0625, %v43_v8 }
  0x1f   :  { %45 = vst [vmem:[#allocation6] sm:$0x1] %v44_v9 }
  0x20   :  { %96 = shalt.err (!%p93_p9)
}
  0x21   :  { %55 = dma.vmem_to_hbm [thread:$0]  %s53_s14, 16, %s130_s1, [#allocation5]  }
  0x22   :  { %107 = dma.done.wait [#allocation5], 16  }
  0x23   :  { %108 = vsyncadd [#allocation5], 4294967280 }
  0x24   :  { %59 = vsyncpa [#allocation4], 1 }
  0x25   :  { %60 = vsyncpa [#allocation5], 1 }

</bundles_post_ra>
